<compile_context>
chip_gen: v7x
topology: tpu7x:2x2x1
jax: 0.10.0
libtpu: 0.0.40
codegen_flags: <defaults>
</compile_context>

<pallas_src>
import jax
import jax.numpy as jnp
from jax import lax
from jax.experimental import pallas as pl
from jax.experimental.pallas import tpu as pltpu


def _cdiv(a, b):
    return (a + b - 1) // b


def _round_up(n, m):
    return _cdiv(n, m) * m


def mlp_kernel(x_ref, w1_ref, b1_ref, w2r_ref, b2_ref, o_ref):
    # Layer 1 on the MXU: f32 x f32 -> f32 (bit-faithful to the torch module).
    h = jnp.dot(x_ref[...], w1_ref[...],
                preferred_element_type=jnp.float32)            # (TILE_B, 16)
    h = jnp.maximum(h + b1_ref[...], 0.0)                      # bias + ReLU (VPU)
    # Layer 2 (16 -> 1): contract the hidden dim of (1,16) with the hidden dim
    # of (TILE_B,16)  ==  w2^T @ h^T.  Result is (1, TILE_B): lane-dense, so
    # the store below is an unmasked full-lane vst and the HBM writeback is a
    # single contiguous stream instead of a 1-lane masked/strided one.
    y_t = lax.dot_general(w2r_ref[...], h,
                          dimension_numbers=(((1,), (1,)), ((), ())),
                          preferred_element_type=jnp.float32)  # (1, TILE_B)
    o_ref[...] = (y_t + b2_ref[...]).astype(o_ref.dtype)


def nn_forward(x, w1, b1, w2, b2, *, tile_b=8192):
    """Pallas implementation of NN.forward: relu(x @ W1 + b1) @ W2 + b2.

    Weights are stored as (in_features, out_features) == torch weight.T.
    tile_b: rows per grid step.  8192 fits the 32 MiB scoped-VMEM default on
    every generation; sweep to 16-32K on v5e/v6e (128 MiB VMEM), keep <=8-16K
    on v7x (64 MiB physical VMEM).
    """
    B, d_in = x.shape
    d_h = w1.shape[1]
    assert w1.shape == (d_in, d_h) and w2.shape == (d_h, 1)
    assert b1.size == d_h and b2.size == 1

    # ---- Tile selection ----------------------------------------------------
    # Multiple of 128 so the (1, tile_b) output block is lane-aligned and the
    # (tile_b, d_in) input block is sublane-aligned.  Don't over-tile tiny B.
    tile_b = max(128, min(_round_up(tile_b, 128), _round_up(B, 128)))
    # Keep >= 2 grid tiles once the batch is big enough to amortize the
    # per-step overhead, so both v7x TensorCores get work ("parallel" axis).
    if B >= 2048 and _cdiv(B, tile_b) < 2:
        tile_b = _round_up(_cdiv(B, 2), 128)
    num_tiles = _cdiv(B, tile_b)          # cdiv grid: no wrapper-side jnp.pad
    b_pad = num_tiles * tile_b

    # ---- Explicit VMEM budget (v7x: 64 MiB physical / 32 MiB scoped default)
    # x block lane-pads 10 -> 128 lanes; the f32 hidden intermediate
    # (tile_b, 16) lane-pads likewise when spilled; the (1, tile_b) output
    # block sublane-pads 1 -> 8.
    x_block = tile_b * 128 * 4             # one lane-padded x buffer
    out_block = 8 * tile_b * 4             # one sublane-padded output buffer
    hidden = tile_b * 128 * 4              # spilled (tile_b, 16) f32 intermediate
    vmem_budget = 2 * x_block + 2 * out_block + 2 * hidden + (2 << 20)
    vmem_limit = min(max(vmem_budget, 32 << 20), 48 << 20)

    # f32 end-to-end (no HBM re-stream: astype is a no-op when already f32).
    x_f = x.astype(jnp.float32)
    w1_f = w1.astype(jnp.float32)
    b1_r = b1.reshape(1, d_h).astype(jnp.float32)
    w2_r = w2.reshape(1, d_h).astype(jnp.float32)   # (16,1) -> row (1,16)
    b2_r = b2.reshape(1, 1).astype(jnp.float32)

    flops = 2 * B * (d_in * d_h + d_h)
    bytes_accessed = (B * d_in * 4                  # x (f32, single pass)
                      + b_pad * 4                   # y (f32, lane-dense)
                      + (d_in * d_h + 2 * d_h + 1) * 4)   # W1, b1, w2 row, b2
    cost = pl.CostEstimate(flops=flops, transcendentals=0,
                           bytes_accessed=bytes_accessed)

    out = pl.pallas_call(
        mlp_kernel,
        out_shape=jax.ShapeDtypeStruct((1, b_pad), jnp.float32),
        grid=(num_tiles,),
        in_specs=[
            # x: tiled along the batch axis (double-buffered / pipelined).
            pl.BlockSpec((tile_b, d_in), lambda i: (i, 0)),
            # Weights / biases: same block every step -> VMEM-resident.
            pl.BlockSpec((d_in, d_h), lambda i: (0, 0)),
            pl.BlockSpec((1, d_h), lambda i: (0, 0)),
            pl.BlockSpec((1, d_h), lambda i: (0, 0)),
            pl.BlockSpec((1, 1), lambda i: (0, 0)),
        ],
        # Lane-dense output row: block (1, tile_b) on array (1, b_pad).
        out_specs=pl.BlockSpec((1, tile_b), lambda i: (0, i)),
        compiler_params=pltpu.CompilerParams(
            dimension_semantics=("parallel",),
            vmem_limit_bytes=vmem_limit),
        cost_estimate=cost,
    )(x_f, w1_f, b1_r, w2_r, b2_r)

    # (1, b_pad) -> (B, 1); reshape of the contiguous buffer is free in XLA.
    return out.reshape(b_pad, 1)[:B]


def init_params(key):
    """Deterministic init mirroring torch.nn.Linear default U[-1/sqrt(fan_in), ...].

    Weights are kept as (in_features, out_features) == PyTorch weight.T.
    """
    k1, k2, k3, k4 = jax.random.split(key, 4)
    bound1 = 1.0 / jnp.sqrt(10.0)
    bound2 = 1.0 / jnp.sqrt(16.0)
    w1 = jax.random.uniform(k1, (10, 16), jnp.float32, -bound1, bound1)
    b1 = jax.random.uniform(k2, (1, 16), jnp.float32, -bound1, bound1)
    w2 = jax.random.uniform(k3, (16, 1), jnp.float32, -bound2, bound2)
    b2 = jax.random.uniform(k4, (1, 1), jnp.float32, -bound2, bound2)
    return w1, b1, w2, b2


if __name__ == "__main__":
    key = jax.random.PRNGKey(0)
    kx, kp = jax.random.split(key)
    batch = 200                                   # small; not a tile multiple
    x = jax.random.normal(kx, (batch, 10), jnp.float32)
    w1, b1, w2, b2 = init_params(kp)

    # tile_b=128 in the demo exercises the multi-tile grid + the overhanging
    # (partial) last block that replaces wrapper-side padding.
    y = jax.block_until_ready(nn_forward(x, w1, b1, w2, b2, tile_b=128))

    # Plain f32 reference (same math as torch's Linear -> ReLU -> Linear),
    # matmuls pinned to highest precision.
    hp = jax.lax.Precision.HIGHEST
    h_ref = jnp.maximum(jnp.dot(x, w1, precision=hp) + b1, 0.0)
    ref = jnp.dot(h_ref, w2, precision=hp) + b2.reshape(1, 1)

    assert y.shape == (batch, 1)
    # Tolerance covers the MXU's f32-matmul pass precision vs the XLA reference.
    assert jnp.allclose(y, ref, atol=3e-2, rtol=3e-2), \
        float(jnp.max(jnp.abs(y - ref)))

    print("KERNEL_OK")
</pallas_src>

<mosaic_0001>
module attributes {stable_mosaic.version = 11 : i64} {
  func.func @mlp_kernel(%arg0: i32, %arg1: memref<128x10xf32, #tpu.memory_space<vmem>>, %arg2: memref<10x16xf32, #tpu.memory_space<vmem>>, %arg3: memref<1x16xf32, #tpu.memory_space<vmem>>, %arg4: memref<1x16xf32, #tpu.memory_space<vmem>>, %arg5: memref<1x1xf32, #tpu.memory_space<vmem>>, %arg6: memref<1x128xf32, #tpu.memory_space<vmem>>) attributes {dimension_semantics = [#tpu.dimension_semantics<parallel>], iteration_bounds = array<i64: 2>, scalar_prefetch = 0 : i64, scratch_operands = 0 : i64, tpu.core_type = #tpu.core_type<tc>, window_params = [{transform_indices = @transform_0, window_bounds = array<i64: 128, 10>}, {pipeline_mode = #tpu.pipeline_mode<synchronous>, transform_indices = @transform_1, window_bounds = array<i64: 10, 16>}, {pipeline_mode = #tpu.pipeline_mode<synchronous>, transform_indices = @transform_2, window_bounds = array<i64: 1, 16>}, {pipeline_mode = #tpu.pipeline_mode<synchronous>, transform_indices = @transform_3, window_bounds = array<i64: 1, 16>}, {pipeline_mode = #tpu.pipeline_mode<synchronous>, transform_indices = @transform_4, window_bounds = array<i64: 1, 1>}, {transform_indices = @transform_5, window_bounds = array<i64: 1, 128>}]} {
    %c0 = arith.constant 0 : index
    %c0_0 = arith.constant 0 : index
    %0 = vector.load %arg1[%c0, %c0_0] : memref<128x10xf32, #tpu.memory_space<vmem>>, vector<128x10xf32>
    %c0_1 = arith.constant 0 : index
    %c0_2 = arith.constant 0 : index
    %1 = vector.load %arg2[%c0_1, %c0_2] : memref<10x16xf32, #tpu.memory_space<vmem>>, vector<10x16xf32>
    %cst = arith.constant dense<0.000000e+00> : vector<128x16xf32>
    %2 = tpu.matmul %0, %1, %cst {dimension_numbers = #tpu.dot_dimension_numbers<[1], [0], [0], [1], [0, 0, 1, 1], [], []>} : vector<128x10xf32>, vector<10x16xf32>, vector<128x16xf32> -> vector<128x16xf32>
    %c0_3 = arith.constant 0 : index
    %c0_4 = arith.constant 0 : index
    %3 = vector.load %arg3[%c0_3, %c0_4] : memref<1x16xf32, #tpu.memory_space<vmem>>, vector<1x16xf32>
    %4 = vector.broadcast %3 : vector<1x16xf32> to vector<128x16xf32>
    %5 = arith.addf %2, %4 : vector<128x16xf32>
    %cst_5 = arith.constant 0.000000e+00 : f32
    %6 = vector.broadcast %cst_5 : f32 to vector<128x16xf32>
    %7 = arith.maximumf %5, %6 : vector<128x16xf32>
    %c0_6 = arith.constant 0 : index
    %c0_7 = arith.constant 0 : index
    %8 = vector.load %arg4[%c0_6, %c0_7] : memref<1x16xf32, #tpu.memory_space<vmem>>, vector<1x16xf32>
    %cst_8 = arith.constant dense<0.000000e+00> : vector<1x128xf32>
    %9 = tpu.matmul %8, %7, %cst_8 {dimension_numbers = #tpu.dot_dimension_numbers<[1], [1], [0], [0], [0, 0, 1, 0], [], []>} : vector<1x16xf32>, vector<128x16xf32>, vector<1x128xf32> -> vector<1x128xf32>
    %c0_9 = arith.constant 0 : index
    %c0_10 = arith.constant 0 : index
    %10 = vector.load %arg5[%c0_9, %c0_10] : memref<1x1xf32, #tpu.memory_space<vmem>>, vector<1x1xf32>
    %11 = vector.broadcast %10 : vector<1x1xf32> to vector<1x128xf32>
    %12 = arith.addf %9, %11 : vector<1x128xf32>
    %c0_11 = arith.constant 0 : index
    %c0_12 = arith.constant 0 : index
    %13 = vector.load %arg6[%c0_11, %c0_12] : memref<1x128xf32, #tpu.memory_space<vmem>>, vector<1x128xf32>
    tpu.vector_store %arg6[%c0_11, %c0_12], %12 {strides = array<i32>} : memref<1x128xf32, #tpu.memory_space<vmem>>, vector<1x128xf32>,
    return
  }
  func.func @transform_0(%arg0: i32) -> (i32, i32) {
    %c0_i32 = arith.constant 0 : i32
    %c0_i32_0 = arith.constant 0 : i32
    return %arg0, %c0_i32 : i32, i32
  }
  func.func @transform_1(%arg0: i32) -> (i32, i32) {
    %c0_i32 = arith.constant 0 : i32
    %c0_i32_0 = arith.constant 0 : i32
    %c0_i32_1 = arith.constant 0 : i32
    return %c0_i32, %c0_i32_0 : i32, i32
  }
  func.func @transform_2(%arg0: i32) -> (i32, i32) {
    %c0_i32 = arith.constant 0 : i32
    %c0_i32_0 = arith.constant 0 : i32
    %c0_i32_1 = arith.constant 0 : i32
    return %c0_i32, %c0_i32_0 : i32, i32
  }
  func.func @transform_3(%arg0: i32) -> (i32, i32) {
    %c0_i32 = arith.constant 0 : i32
    %c0_i32_0 = arith.constant 0 : i32
    %c0_i32_1 = arith.constant 0 : i32
    return %c0_i32, %c0_i32_0 : i32, i32
  }
  func.func @transform_4(%arg0: i32) -> (i32, i32) {
    %c0_i32 = arith.constant 0 : i32
    %c0_i32_0 = arith.constant 0 : i32
    %c0_i32_1 = arith.constant 0 : i32
    return %c0_i32, %c0_i32_0 : i32, i32
  }
  func.func @transform_5(%arg0: i32) -> (i32, i32) {
    %c0_i32 = arith.constant 0 : i32
    %c0_i32_0 = arith.constant 0 : i32
    return %c0_i32, %arg0 : i32, i32
  }
}

</mosaic_0001>

<bundles_post_ra>
// kernel: tpu_custom_call.1
= control target key start
LH: loop header
LB: loop body
LE: loop exit
PB: predicated region body
PF: predicated region fallthrough
CT: control target
= control target key end

     0   :  { %s1191_s0 = inlined_call_operand.vmem [shape: f32[200,10], index: 0, kind: input, shape index: {}]   ;;  %s1192_s1 = inlined_call_operand.vmem [shape: f32[10,16], index: 1, kind: input, shape index: {}]   ;;  %s1193_s2 = inlined_call_operand.vmem [shape: f32[1,16], index: 2, kind: input, shape index: {}]   ;;  %s1194_s3 = inlined_call_operand.vmem [shape: f32[1,16], index: 3, kind: input, shape index: {}]   ;;  %s1195_s4 = inlined_call_operand.<no memory space> [shape: f32[1,1], index: 4, kind: input, shape index: {}]   ;;  %s1196_s5 = inlined_call_operand.hbm [shape: f32[1,256], index: 5, kind: output, shape index: {}]  }
   0x1   :  { %v10_v0 = vstv %s1195_s4 }
   0x2   :  { %11 = vst [vmem:[#allocation2] sm:$0x1] %v10_v0 }
   0x3   :  { %12 = vsyncpa [#allocation4], 0 }
   0x4   :  { %14 = vsyncpa [#allocation4 + $0x1], 0  ;;  %s1015_s20 = smov 0   ;;  %s1017_s21 = smov 0  }
   0x5   :  { %s1019_s22 = smov 0   ;;  %s1021_s23 = smov 0  }
   0x6 LB: > { %s686_s4 = sadd.s32 4294967295, %s974_s23   ;;  %s687_s24 = sadd.s32 4294967294, %s974_s23   ;;  %s974_s23 = sphi %s1021_s23, %s1204_s23   ;;  %s970_s22 = sphi %s1019_s22, %s1203_s22   ;;  %s966_s21 = sphi %s1017_s21, %s1202_s21   ;;  %s962_s20 = sphi %s1015_s20, %s1201_s20  }
   0x7   : > { %s1038_s25 = sadd.s32 1, %s974_s23   ;;  %s137_s26 = sadd.s32 1, %s970_s22 }
   0x8   : > { %s134_s27 = ssub.s32 %s974_s23, %s1038_s25  ;;  %p147_p0 = scmp.ne.s32.totalorder %s970_s22, %s966_s21 }
   0x9   : > { %p135_p1 = scmp.eq.s32.totalorder %s134_s27, 0  ;;  %p148_p2 = scmp.eq.s32.totalorder %s686_s4, 1 }
   0xa   : > { %p153_p3 = scmp.ne.s32.totalorder %s966_s21, %s962_s20  ;;  %p154_p4 = scmp.eq.s32.totalorder %s687_s24, 1 }
   0xb   : > { %s1048_s28 = scalar_select %p135_p1, %s970_s22, %s137_s26  }
   0xc   : > { %p1050_p5 = por %p148_p2, %p147_p0  ;;  %p1054_p6 = por %p154_p4, %p153_p3 }
   0xd   : > { %p690_p7 = scmp.ge.s32.totalorder %s974_s23, 1  ;;  %p201_p8 = scmp.lt.s32.totalorder %s974_s23, 3 }
   0xf   : > { %p202_p9 = pnand %p690_p7, %p201_p8 }
  0x10   : > { %v262_v1 = vld [vmem:[%s1192_s1] sm:$0xff] (!%p202_p9)  ;;  %v263_v2 = vld [vmem:[%s1192_s1 + $0x8] sm:$0x3] (!%p202_p9)  ;;  %vm320_vm0 = vcmask (!%p202_p9), 1041408   ;;  %s1066_s10 = sshll.u32 (!%p202_p9), %s686_s4, 4  ;;  %vm976_vm1 = vmmov (!%p202_p9), 1  }
  0x11   : > { %205 = sbr.rel (%p202_p9) target bundleno = 540 (0x21c), region = 40  ;;  %v829_v3 = vpack.c.bf16 (!%p202_p9), %v263_v2, %v262_v1  ;;  %vm830_vm2 = vmpackc.low (!%p202_p9), %vm320_vm0, %vm976_vm1  ;;  %p237_p10 = scmp.lt.s32.totalorder (!%p202_p9), %s1066_s10, 24  ;;  %vm271_vm3 = vcmask (!%p202_p9), 80896   ;;  %v977_v20 = vmov (!%p202_p9), 0.0|0.0   ;;  %vm978_vm4 = vmmov (!%p202_p9), 0  }
  0x12   : > { %835 = vmatprep.subr.bf16.mxu1 (!%p202_p9), %v977_v20  ;;  %v979_v21 = vmov (!%p202_p9), 0.0   ;;  %v486_v22 = vld [vmem:[#allocation2] sm:$0x1] (!%p202_p9)  ;;  %v980_v23 = vmov (!%p202_p9), 0   ;;  %vm496_vm5 = vcmask (!%p202_p9), 130048   ;;  %s230_s4 = sand.u32 (!%p202_p9), 1, %s966_s21   ;;  %s1149_s7 = scalar_lea.hbm (!%p202_p9), %s1196_s5, %s1066_s10 }
  0x13   : > { %831 = vmatprep.subr.msk.bf16.mxu0 (!%p202_p9), %vm830_vm2, %v829_v3  ;;  %826 = vmatprep.mubr.msk.f32.mxu1 (!%p202_p9), %vm978_vm4, %v979_v21  ;;  %v693_v24 = vld [vmem:[%s1193_s2] ss:$0 sm:$0xff] (!%p202_p9)  ;;  %vm1113_vm6 = vmpackc.low (!%p202_p9), %vm496_vm5, %vm496_vm5  ;;  %s231_s24 = scalar_lea.vmem (!%p202_p9), [#allocation3], %s230_s4  ;;  %s620_s8 = scalar_lea.sflag (!%p202_p9), [#allocation4], %s230_s4 }
  0x14   : > { %834 = vmatpush3.bf16.msk.msra.mxu0 (!%p202_p9), %vm830_vm2, %v829_v3  ;;  %911 = vset.pattern.permute.xlu0 (!%p202_p9), %v980_v23  ;;  %s632_s26 = sshll.u32 (!%p202_p9), %s231_s24, 4  ;;  %s1151_s26 = int_to_ptr.vmem [resolvable:$true] %s632_s26 }
  0x15   : > { %489 = vperm.xlu0 (!%p202_p9), %911, %v486_v22   ;;  %s912_s9 = scalar_lea.vmem (!%p202_p9), %s1151_s26, 16 }
  0x16   : > { %p913_p11 = scmp.ne.s32.totalorder (!%p202_p9), %s1151_s26, %s912_s9 }
  0x18   : > { %s238_s11 = scalar_select %p237_p10, %s1066_s10, 24 }
  0x19   : > { %p914_p12 = pnand %p913_p11, %p1050_p5 }
  0x1a   : > { %s692_s12 = sshll.u32 %s238_s11, 3  ;;  %s981_s11 = smov [#allocation3]  }
  0x1b   : > { %s1073_s15 = scalar_lea.vmem %s1191_s0, %s692_s12  ;;  %p915_p13 = pneg %p914_p12 }
  0x1c   : > { %v246_v4 = vld [vmem:[%s1073_s15] sm:$0xff]  ;;  %v247_v5 = vld [vmem:[%s1073_s15 + $0x8] sm:$0xff]  ;;  %v248_v6 = vld [vmem:[%s1073_s15 + $0x10] sm:$0xff]  ;;  %s916_s12 = sshll.u32 %s981_s11, 4  ;;  %s917_s12 = int_to_ptr.vmem [resolvable:$false] %s916_s12 }
  0x1d   : > { %770 = vmatprep.mubr.msk.f32.mxu0 %vm271_vm3, %v246_v4  ;;  %v249_v7 = vld [vmem:[%s1073_s15 + $0x18] sm:$0xff]  ;;  %v250_v8 = vld [vmem:[%s1073_s15 + $0x20] sm:$0xff]  ;;  %v251_v9 = vld [vmem:[%s1073_s15 + $0x28] sm:$0xff]  ;;  %s918_s13 = scalar_lea.vmem %s917_s12, 32  ;;  %p919_p0 = scmp.lt.s32.totalorder %s1151_s26, %s917_s12 }
  0x1e   : > { %771 = vmatmul.mubr.msk.f32.vlgmr.msra.gmra.mrb[0].mxu0 %vm271_vm3, %v247_v5  ;;  %v252_v10 = vld [vmem:[%s1073_s15 + $0x30] sm:$0xff]  ;;  %v253_v11 = vld [vmem:[%s1073_s15 + $0x38] sm:$0xff]  ;;  %v254_v12 = vld [vmem:[%s1073_s15 + $0x40] sm:$0xff]  ;;  %p920_p1 = scmp.lt.s32.totalorder %s918_s13, %s912_s9 }
  0x1f   : > { %773 = vmatprep.mubr.msk.f32.mxu0 %vm271_vm3, %v248_v6  ;;  %v255_v13 = vld [vmem:[%s1073_s15 + $0x48] sm:$0xff]  ;;  %v256_v14 = vld [vmem:[%s1073_s15 + $0x50] sm:$0xff]  ;;  %v257_v15 = vld [vmem:[%s1073_s15 + $0x58] sm:$0xff] }
  0x20   : > { %v258_v16 = vld [vmem:[%s1073_s15 + $0x60] sm:$0xff]  ;;  %v259_v17 = vld [vmem:[%s1073_s15 + $0x68] sm:$0xff]  ;;  %v260_v18 = vld [vmem:[%s1073_s15 + $0x70] sm:$0xff]  ;;  %p921_p2 = por %p920_p1, %p919_p0 }
  0x21   : > { %v261_v19 = vld [vmem:[%s1073_s15 + $0x78] sm:$0xff] }
  0x22   : > { %774 = vmatmul.mubr.msk.f32.gmra.mrb[2].mxu0 %vm271_vm3, %v249_v7  ;;  %p922_p3 = pnand %p921_p2, %p915_p13 }
  0x23   : > { %776 = vmatprep.mubr.msk.f32.mxu0 %vm271_vm3, %v250_v8 }
  0x26   : > { %777 = vmatmul.mubr.msk.f32.gmra.mrb[4].mxu0 %vm271_vm3, %v251_v9 }
  0x27   : > { %779 = vmatprep.mubr.msk.f32.mxu0 %vm271_vm3, %v252_v10 }
  0x2a   : > { %780 = vmatmul.mubr.msk.f32.gmra.mrb[6].mxu0 %vm271_vm3, %v253_v11 }
  0x2b   : > { %782 = vmatprep.mubr.msk.f32.mxu0 %vm271_vm3, %v254_v12 }
  0x2e   : > { %783 = vmatmul.mubr.msk.f32.gmra.mrb[8].mxu0 %vm271_vm3, %v255_v13 }
  0x2f   : > { %785 = vmatprep.mubr.msk.f32.mxu0 %vm271_vm3, %v256_v14 }
  0x32   : > { %786 = vmatmul.mubr.msk.f32.gmra.mrb[10].mxu0 %vm271_vm3, %v257_v15 }
  0x33   : > { %788 = vmatprep.mubr.msk.f32.mxu0 %vm271_vm3, %v258_v16 }
  0x36   : > { %789 = vmatmul.mubr.msk.f32.gmra.mrb[12].mxu0 %vm271_vm3, %v259_v17 }
  0x37   : > { %791 = vmatprep.mubr.msk.f32.mxu0 %vm271_vm3, %v260_v18  ;;  %v485_v18 = vld [vmem:[%s1194_s3] sm:$0x1] }
  0x3a   : > { %792 = vmatmul.mubr.msk.f32.gmra.mrb[14].mxu0 %vm271_vm3, %v261_v19  ;;  %v492_v19 = vlaneseq }
  0x3c   : > { %v493_v21 = vshrl.u32 %v492_v19, 7 }
  0x3e   : > { %v494_v22 = vsub.s32 0, %v493_v21 }
  0x94   : > { %v490_v23 = vpop.permute.xlu0 %489 }
  0xf1   : > { %v772_v25 = vpop.f32.mrb[0].mxu0 }
  0xf2   : > { %v396_v26 = vadd.f32 %v772_v25, %v693_v24  ;;  %v390_v27 = vpop.f32.mrb[1].mxu0 }
  0xf3   : > { %v391_v28 = vadd.f32 %v693_v24, %v390_v27 }
  0xf4   : > { %v470_v29 = vmax.f32 %v396_v26, 0.0 }
  0xf5   : > { %v469_v30 = vmax.f32 %v391_v28, 0.0  ;;  %v775_v31 = vpop.f32.mrb[2].mxu0 }
  0xf6   : > { %v406_v32 = vadd.f32 %v775_v31, %v693_v24  ;;  %v400_v33 = vpop.f32.mrb[3].mxu0 }
  0xf7   : > { %v836_v35 = vpack.c.bf16 %v470_v29, %v469_v30  ;;  %v401_v36 = vadd.f32 %v693_v24, %v400_v33 }
  0xf8   : > { %v472_v37 = vmax.f32 %v406_v32, 0.0 }
  0xf9   : > { %v471_v38 = vmax.f32 %v401_v36, 0.0  ;;  %838 = vmatpush3.bf16.xpose.msk.msra.mxu1 %vm1113_vm6, %v836_v35  ;;  %v778_v39 = vpop.f32.mrb[4].mxu0 }
  0xfa   : > { %v416_v40 = vadd.f32 %v778_v39, %v693_v24  ;;  %839 = vmatprep.subr.bf16.mxu1 %v977_v20  ;;  %v410_v41 = vpop.f32.mrb[5].mxu0 }
  0xfb   : > { %v840_v42 = vpack.c.bf16 %v472_v37, %v471_v38  ;;  %v411_v43 = vadd.f32 %v693_v24, %v410_v41 }
  0xfc   : > { %v474_v44 = vmax.f32 %v416_v40, 0.0 }
  0xfd   : > { %v473_v45 = vmax.f32 %v411_v43, 0.0  ;;  %v781_v46 = vpop.f32.mrb[6].mxu0 }
  0xfe   : > { %v426_v47 = vadd.f32 %v781_v46, %v693_v24  ;;  %v420_v48 = vpop.f32.mrb[7].mxu0 }
  0xff   : > { %v844_v49 = vpack.c.bf16 %v474_v44, %v473_v45  ;;  %v421_v50 = vadd.f32 %v693_v24, %v420_v48 }
 0x100   : > { %v476_v51 = vmax.f32 %v426_v47, 0.0 }
 0x101   : > { %842 = vmatpush3.bf16.xpose.msk.msra.mxu1 %vm1113_vm6, %v840_v42  ;;  %v475_v52 = vmax.f32 %v421_v50, 0.0  ;;  %v784_v53 = vpop.f32.mrb[8].mxu0 }
 0x102   : > { %843 = vmatprep.subr.bf16.mxu1 %v977_v20  ;;  %v436_v54 = vadd.f32 %v784_v53, %v693_v24  ;;  %v430_v55 = vpop.f32.mrb[9].mxu0 }
 0x103   : > { %v848_v56 = vpack.c.bf16 %v476_v51, %v475_v52  ;;  %v431_v57 = vadd.f32 %v693_v24, %v430_v55 }
 0x104   : > { %v478_v58 = vmax.f32 %v436_v54, 0.0 }
 0x105   : > { %v477_v59 = vmax.f32 %v431_v57, 0.0  ;;  %v787_v60 = vpop.f32.mrb[10].mxu0 }
 0x106   : > { %v446_v61 = vadd.f32 %v787_v60, %v693_v24  ;;  %v440_v62 = vpop.f32.mrb[11].mxu0 }
 0x107   : > { %v852_v63 = vpack.c.bf16 %v478_v58, %v477_v59  ;;  %v441_v0 = vadd.f32 %v693_v24, %v440_v62 }
 0x108   : > { %v480_v1 = vmax.f32 %v446_v61, 0.0 }
 0x109   : > { %846 = vmatpush3.bf16.xpose.msk.msra.mxu1 %vm1113_vm6, %v844_v49  ;;  %v479_v2 = vmax.f32 %v441_v0, 0.0  ;;  %v790_v3 = vpop.f32.mrb[12].mxu0 }
 0x10a   : > { %847 = vmatprep.subr.bf16.mxu1 %v977_v20  ;;  %v456_v4 = vadd.f32 %v790_v3, %v693_v24  ;;  %v450_v5 = vpop.f32.mrb[13].mxu0 }
 0x10b   : > { %v856_v6 = vpack.c.bf16 %v480_v1, %v479_v2  ;;  %v451_v7 = vadd.f32 %v693_v24, %v450_v5 }
 0x10c   : > { %v482_v8 = vmax.f32 %v456_v4, 0.0 }
 0x10d   : > { %v481_v9 = vmax.f32 %v451_v7, 0.0  ;;  %v793_v10 = vpop.f32.mrb[14].mxu0 }
 0x10e   : > { %v466_v11 = vadd.f32 %v793_v10, %v693_v24  ;;  %v460_v12 = vpop.f32.mrb[15].mxu0 }
 0x10f   : > { %v860_v13 = vpack.c.bf16 %v482_v8, %v481_v9  ;;  %v461_v14 = vadd.f32 %v693_v24, %v460_v12  ;;  %v495_v24 = vrot.slane %v490_v23, %v494_v22 }
 0x110   : > { %v484_v15 = vmax.f32 %v466_v11, 0.0 }
 0x111   : > { %850 = vmatpush3.bf16.xpose.msk.msra.mxu1 %vm1113_vm6, %v848_v56  ;;  %v483_v16 = vmax.f32 %v461_v14, 0.0 }
 0x112   : > { %851 = vmatprep.subr.bf16.mxu1 %v977_v20 }
 0x113   : > { %v864_v17 = vpack.c.bf16 %v484_v15, %v483_v16 }
 0x119   : > { %854 = vmatpush3.bf16.xpose.msk.msra.mxu1 %vm1113_vm6, %v852_v63 }
 0x11a   : > { %855 = vmatprep.subr.bf16.mxu1 %v977_v20 }
 0x121   : > { %858 = vmatpush3.bf16.xpose.msk.msra.mxu1 %vm1113_vm6, %v856_v6 }
 0x122   : > { %859 = vmatprep.subr.bf16.mxu1 %v977_v20 }
 0x129   : > { %862 = vmatpush3.bf16.xpose.msk.msra.mxu1 %vm1113_vm6, %v860_v13 }
 0x12a   : > { %863 = vmatprep.subr.bf16.mxu1 %v977_v20 }
 0x131   : > { %866 = vmatpush3.bf16.xpose.msk.msra.mxu1 %vm1113_vm6, %v864_v17 }
 0x138   : > { %827 = vmatmul.mubr.msk.f32.vlgmr.msra.gmra.mrb[0].mxu1 %vm496_vm5, %v485_v18 }
 0x20b   : > { %v614_v25 = vpop.f32.mrb[0].mxu1 }
 0x20c   : > { %v615_v20 = vadd.f32 %v614_v25, %v495_v24  ;;  %v828_v26 = vpop.f32.mrb[1].mxu1 }
 0x20e   : > { %618 = vst [vmem:[%s231_s24] sm:$0x1] %v615_v20 }
 0x20f   : > { %925 = shalt.err (!%p922_p3)
}
 0x210   : > { %s926_s10 = scalar_lea.hbm %s1149_s7, 16  ;;  %s930_s16 = scalar_lea.hbm %s1196_s5, 32 }
 0x211   : > { %p927_p4 = scmp.ne.s32.totalorder %s1149_s7, %s926_s10  ;;  %p931_p9 = scmp.lt.u32.totalorder %s1149_s7, %s1196_s5 }
 0x212   : > { %p932_p10 = scmp.lt.u32.totalorder %s930_s16, %s926_s10  ;;  %p934_p12 = scmp.lt.u32.totalorder %s926_s10, %s1149_s7 }
 0x213   : > { %p928_p7 = pnand %p927_p4, %p1050_p5 }
 0x214   : > { %p933_p11 = por %p932_p10, %p931_p9 }
 0x215   : > { %p929_p8 = pneg %p928_p7 }
 0x216   : > { %p935_p13 = por %p934_p12, %p933_p11 }
 0x218   : > { %p936_p0 = pnand %p935_p13, %p929_p8 }
 0x21a   : > { %939 = shalt.err (!%p936_p0)
}
 0x21b   : > { %867 = dma.vmem_to_hbm [thread:$0]  (%p1050_p5), %s1151_s26, 16, %s1149_s7, %s620_s8  }
 0x21c PF: > { %p873_p1 = scmp.ge.s32.totalorder %s974_s23, 2  ;;  %s644_s19 = sand.u32 1, %s962_s20  }
 0x21d   : > { %s645_s4 = scalar_lea.sflag [#allocation4], %s644_s19 }
 0x21e   : > { %p870_p2 = pnand %p873_p1, %p1054_p6 }
 0x220   : > { %957 = dma.done.wait (!%p870_p2), %s645_s4, 16  }
 0x221   : > { %959 = vsyncadd (!%p870_p2), %s645_s4, 4294967280  ;;  %p17_p3 = scmp.ge.s32.totalorder %s1038_s25, 4   ;;  %s1201_s20 = smov %s966_s21 }
 0x222   : > { %s1202_s21 = smov %s970_s22  ;;  %s1203_s22 = smov %s1048_s28 }
 0x223   : > { %s1204_s23 = smov %s1038_s25  ;;  %19 = sbr.rel (!%p17_p3) target bundleno = 6 (0x6), region = 75 }
 0x22a   :  { %649 = vsyncpa [#allocation4], 1 }
 0x22b   :  { %651 = vsyncpa [#allocation4 + $0x1], 1 }

</bundles_post_ra>
